<compile_context>
chip_gen: v6e
topology: v6e:2x2x1
jax: 0.10.0
libtpu: 0.0.40
codegen_flags: <defaults>
</compile_context>

<pallas_src>
import jax
import jax.numpy as jnp
import numpy as np
from jax.experimental import pallas as pl
from jax.experimental.pallas import tpu as pltpu


# ----------------------------------------------------------------------------
# In-kernel helpers
# ----------------------------------------------------------------------------
def _pointwise(w, x, acc):
    """1x1 conv on a (c_in, tile) block: acc + w @ x, unrolled VPU MADs (f32)."""
    for k in range(x.shape[0]):
        acc = acc + w[:, k:k + 1] * x[k:k + 1, :]
    return acc


def _cppn_kernel_inp(inp_ref, h_ref, w_in_ref, b_in_ref, w2_ref, b2_ref,
                     out_ref):
    """ablate_input=True: u = h_xyr + scale*b_in + (scale*W_in) @ inp."""
    # Accumulator initialized with the streamed xyr term + (already scaled)
    # input bias -- no separate full-tile add afterwards.
    u = h_ref[...] + b_in_ref[...]
    u = _pointwise(w_in_ref[...], inp_ref[...], u)
    out = _pointwise(w2_ref[...], jnp.tanh(u), b2_ref[...])
    out_ref[...] = out.astype(out_ref.dtype)


def _cppn_kernel_noinp(h_ref, w2_ref, b2_ref, out_ref):
    """ablate_input=False: batch-independent, input conv contributes 0."""
    out = _pointwise(w2_ref[...], jnp.tanh(h_ref[...]), b2_ref[...])
    out_ref[...] = out.astype(out_ref.dtype)


# ----------------------------------------------------------------------------
# Tiling
# ----------------------------------------------------------------------------
# (c_in + c_hid + c_out) <= 20 rows of f32 * 32768 lanes ~= 2.5 MiB per step,
# double-buffered ~5 MiB: safe under v5e's 16 MiB default scoped-VMEM limit.
# (v6e/v7x could take 65536; 32768 is kept so one build is safe everywhere.)
_MAX_TILE_PIX = 32768


def _round_up(x, m):
    return -(-x // m) * m


def _choose_tiling(n_pix, *, min_steps=1):
    """Pick (tile, n_pad): largest multiple-of-128 divisor of n_pix first."""
    limit = min(_MAX_TILE_PIX, n_pix)
    t = (limit // 128) * 128
    while t >= 128:
        if n_pix % t == 0 and n_pix // t >= min_steps:
            return t, n_pix                      # exact: no pad / slice copies
        t -= 128
    # Ragged fallback: pad the pixel axis (wrapper pads inputs / slices output).
    tile = min(_MAX_TILE_PIX, _round_up(pl.cdiv(n_pix, max(min_steps, 1)), 128))
    return tile, _round_up(n_pix, tile)


# ----------------------------------------------------------------------------
# pallas_call wrappers
# ----------------------------------------------------------------------------
def _cppn_forward_with_input(inp3, h_xyr, w_in, b_in, w2, b2, *, scale, batch):
    """ablate_input=True path.  inp3: (B, c_in, n_pix), h_xyr: (c_hid, n_pix)."""
    c_in = inp3.shape[1]
    c_hid, n_pix = h_xyr.shape
    c_out = w2.shape[0]

    # Keep >=2 grid steps when batch==1 so both v7x TensorCores get work.
    tile, n_pad = _choose_tiling(n_pix, min_steps=2 if batch == 1 else 1)
    if n_pad != n_pix:
        inp3 = jnp.pad(inp3, ((0, 0), (0, 0), (0, n_pad - n_pix)))
        h_xyr = jnp.pad(h_xyr, ((0, 0), (0, n_pad - n_pix)))

    # `scale` is a static Python float: fold it into the tiny conv params
    # at trace time (removes per-tile scaling inside the kernel).
    w_in_s = w_in * scale
    b_in_s = b_in * scale

    const = lambda i, j: (0, 0)
    return pl.pallas_call(
        _cppn_kernel_inp,
        out_shape=jax.ShapeDtypeStruct((batch, c_out, n_pad), jnp.float32),
        grid_spec=pltpu.PrefetchScalarGridSpec(
            num_scalar_prefetch=0,
            grid=(batch, n_pad // tile),
            in_specs=[
                pl.BlockSpec((None, c_in, tile), lambda i, j: (i, 0, j)),  # inp
                pl.BlockSpec((c_hid, tile), lambda i, j: (0, j)),          # h_xyr
                pl.BlockSpec((c_hid, c_in), const),                        # W_in*s
                pl.BlockSpec((c_hid, 1), const),                           # b_in*s
                pl.BlockSpec((c_out, c_hid), const),                       # W2
                pl.BlockSpec((c_out, 1), const),                           # b2
            ],
            out_specs=pl.BlockSpec((None, c_out, tile), lambda i, j: (i, 0, j)),
        ),
        compiler_params=pltpu.CompilerParams(
            dimension_semantics=("parallel", "parallel")),
    )(inp3, h_xyr, w_in_s, b_in_s, w2, b2)


def _cppn_forward_noinp(h_xyr, w2, b2):
    """ablate_input=False path: batch axis removed, grid over pixel tiles only."""
    c_hid, n_pix = h_xyr.shape
    c_out = w2.shape[0]

    tile, n_pad = _choose_tiling(n_pix, min_steps=2)   # v7x: 2 TensorCores
    if n_pad != n_pix:
        h_xyr = jnp.pad(h_xyr, ((0, 0), (0, n_pad - n_pix)))

    const = lambda j: (0, 0)
    return pl.pallas_call(
        _cppn_kernel_noinp,
        out_shape=jax.ShapeDtypeStruct((c_out, n_pad), jnp.float32),
        grid_spec=pltpu.PrefetchScalarGridSpec(
            num_scalar_prefetch=0,
            grid=(n_pad // tile,),
            in_specs=[
                pl.BlockSpec((c_hid, tile), lambda j: (0, j)),   # h_xyr
                pl.BlockSpec((c_out, c_hid), const),             # W2
                pl.BlockSpec((c_out, 1), const),                 # b2
            ],
            out_specs=pl.BlockSpec((c_out, tile), lambda j: (0, j)),
        ),
        compiler_params=pltpu.CompilerParams(
            dimension_semantics=("parallel",)),
    )(h_xyr, w2, b2)


# ----------------------------------------------------------------------------
# Module: parameters + wrapper (glue in JAX)
# ----------------------------------------------------------------------------
class BendingCPPNPallas:
    def __init__(self, n_channels, input_size, key):
        self.input_size = input_size
        self.in_channels = self.out_channels = n_channels
        self.hid_channels = n_channels * 2

        k = jax.random.split(key, 6)

        def conv1x1_params(kw, kb, c_in, c_out):
            # Deterministic init ~ PyTorch Conv2d default (uniform +/- 1/sqrt(fan_in))
            bound = 1.0 / np.sqrt(c_in)
            w = jax.random.uniform(kw, (c_out, c_in), jnp.float32, -bound, bound)
            b = jax.random.uniform(kb, (c_out,), jnp.float32, -bound, bound)
            return w, b.reshape(c_out, 1)

        # Channels-first weights, exactly the PyTorch (out, in) 1x1 layout.
        self.w_in, self.b_in = conv1x1_params(k[0], k[1],
                                              self.in_channels, self.hid_channels)
        self.w_xyr, self.b_xyr = conv1x1_params(k[2], k[3], 3, self.hid_channels)
        self.w2, self.b2 = conv1x1_params(k[4], k[5],
                                          self.hid_channels, self.out_channels)

        # Coordinate grids (mirror torch.meshgrid indexing='xy').
        s = input_size
        x, y = jnp.meshgrid(jnp.arange(s), jnp.arange(s), indexing="xy")
        self.x = x.astype(jnp.float32)
        self.y = y.astype(jnp.float32)
        center = s // 2
        rx, ry = jnp.meshgrid(jnp.arange(s) - center, jnp.arange(s) - center,
                              indexing="xy")
        self.r = jnp.sqrt((rx ** 2 + ry ** 2).astype(jnp.float32))

        # Precompute the batch-/tile-invariant xyr term ONCE:
        # h_xyr = W_xyr @ [x; y; r] + b_xyr, shape (c_hid, n_pix), streamed into
        # the kernel lane-dense.  (Weights are fixed after __init__ here.)
        xyr = jnp.stack([self.x, self.y, self.r], axis=0).reshape(3, s * s)
        self._h_xyr = (jnp.einsum("oc,cp->op", self.w_xyr, xyr,
                                  precision=jax.lax.Precision.HIGHEST)
                       + self.b_xyr).astype(jnp.float32)

    def __call__(self, inp, ablate_input=False):
        # inp: NCHW, (B, C, S, S)
        b, c, s, _ = inp.shape
        assert s == self.input_size and c == self.in_channels
        scale = float(ablate_input)
        n_pix = s * s
        c_out = self.out_channels

        if scale != 0.0:
            out3 = _cppn_forward_with_input(
                inp.reshape(b, c, n_pix),        # free reshape, NCHW stays NCHW
                self._h_xyr, self.w_in, self.b_in, self.w2, self.b2,
                scale=scale, batch=b)
            return out3[:, :, :n_pix].reshape(b, c_out, s, s)

        # Default path: batch-independent result computed once, broadcast after.
        out2 = _cppn_forward_noinp(self._h_xyr, self.w2, self.b2)[:, :n_pix]
        return jnp.broadcast_to(out2[None], (b, c_out, n_pix)).reshape(
            b, c_out, s, s)

    # Pure-JAX reference (mirrors the PyTorch forward) for verification.
    def reference(self, inp, ablate_input=False):
        b = inp.shape[0]
        s = self.input_size
        xyr = jnp.stack([self.x, self.y, self.r], axis=0)           # (3, S, S)
        xyr = jnp.broadcast_to(xyr[None], (b, 3, s, s))
        hp = jax.lax.Precision.HIGHEST

        def conv1x1(w, bias, t):
            y = jnp.einsum("oc,bchw->bohw", w, t, precision=hp)
            return y + bias.reshape(1, -1, 1, 1)

        u = (float(ablate_input) * conv1x1(self.w_in, self.b_in, inp)
             + conv1x1(self.w_xyr, self.b_xyr, xyr))
        return conv1x1(self.w2, self.b2, jnp.tanh(u))


if __name__ == "__main__":
    key = jax.random.PRNGKey(0)
    k_params, k_inp, k_params2, k_inp2 = jax.random.split(key, 4)

    # Primary test: batch=2, channels=4, spatial=16 (divisor-exact tiling path).
    n_channels, input_size, batch = 4, 16, 2
    module = BendingCPPNPallas(n_channels, input_size, k_params)
    inp = jax.random.normal(k_inp, (batch, n_channels, input_size, input_size),
                            dtype=jnp.float32)

    out1 = jax.block_until_ready(module(inp, ablate_input=True))
    ref1 = module.reference(inp, ablate_input=True)
    np.testing.assert_allclose(np.asarray(out1), np.asarray(ref1),
                               rtol=1e-5, atol=1e-5)

    out0 = jax.block_until_ready(module(inp))            # default / noinp path
    ref0 = module.reference(inp)
    np.testing.assert_allclose(np.asarray(out0), np.asarray(ref0),
                               rtol=1e-5, atol=1e-5)

    # Secondary test: ragged spatial size (pad fallback) and batch=1
    # (>=2 grid steps heuristic).
    module2 = BendingCPPNPallas(4, 12, k_params2)
    inp2 = jax.random.normal(k_inp2, (1, 4, 12, 12), dtype=jnp.float32)
    out2a = jax.block_until_ready(module2(inp2, ablate_input=True))
    np.testing.assert_allclose(np.asarray(out2a),
                               np.asarray(module2.reference(inp2, True)),
                               rtol=1e-5, atol=1e-5)
    out2b = jax.block_until_ready(module2(inp2))
    np.testing.assert_allclose(np.asarray(out2b),
                               np.asarray(module2.reference(inp2)),
                               rtol=1e-5, atol=1e-5)

    print("KERNEL_OK")
</pallas_src>

<mosaic_0001>
module attributes {stable_mosaic.version = 11 : i64} {
  func.func @_cppn_kernel_inp(%arg0: i32, %arg1: i32, %arg2: memref<1x4x256xf32, #tpu.memory_space<vmem>>, %arg3: memref<8x256xf32, #tpu.memory_space<vmem>>, %arg4: memref<8x4xf32, #tpu.memory_space<vmem>>, %arg5: memref<8x1xf32, #tpu.memory_space<vmem>>, %arg6: memref<4x8xf32, #tpu.memory_space<vmem>>, %arg7: memref<4x1xf32, #tpu.memory_space<vmem>>, %arg8: memref<1x4x256xf32, #tpu.memory_space<vmem>>) attributes {dimension_semantics = [#tpu.dimension_semantics<parallel>, #tpu.dimension_semantics<parallel>], iteration_bounds = array<i64: 2, 1>, scalar_prefetch = 0 : i64, scratch_operands = 0 : i64, tpu.core_type = #tpu.core_type<tc>, window_params = [{transform_indices = @transform_0, window_bounds = array<i64: 1, 4, 256>}, {transform_indices = @transform_1, window_bounds = array<i64: 8, 256>}, {pipeline_mode = #tpu.pipeline_mode<synchronous>, transform_indices = @transform_2, window_bounds = array<i64: 8, 4>}, {pipeline_mode = #tpu.pipeline_mode<synchronous>, transform_indices = @transform_3, window_bounds = array<i64: 8, 1>}, {pipeline_mode = #tpu.pipeline_mode<synchronous>, transform_indices = @transform_4, window_bounds = array<i64: 4, 8>}, {pipeline_mode = #tpu.pipeline_mode<synchronous>, transform_indices = @transform_5, window_bounds = array<i64: 4, 1>}, {transform_indices = @transform_6, window_bounds = array<i64: 1, 4, 256>}]} {
    %c0 = arith.constant 0 : index
    %c0_0 = arith.constant 0 : index
    %0 = vector.load %arg3[%c0, %c0_0] : memref<8x256xf32, #tpu.memory_space<vmem>>, vector<8x256xf32>
    %c0_1 = arith.constant 0 : index
    %c0_2 = arith.constant 0 : index
    %1 = vector.load %arg5[%c0_1, %c0_2] : memref<8x1xf32, #tpu.memory_space<vmem>>, vector<8x1xf32>
    %2 = vector.broadcast %1 : vector<8x1xf32> to vector<8x256xf32>
    %3 = arith.addf %0, %2 : vector<8x256xf32>
    %c0_3 = arith.constant 0 : index
    %c0_4 = arith.constant 0 : index
    %4 = vector.load %arg4[%c0_3, %c0_4] : memref<8x4xf32, #tpu.memory_space<vmem>>, vector<8x4xf32>
    %c0_5 = arith.constant 0 : index
    %c0_6 = arith.constant 0 : index
    %c0_7 = arith.constant 0 : index
    %5 = vector.load %arg2[%c0_5, %c0_6, %c0_7] : memref<1x4x256xf32, #tpu.memory_space<vmem>>, vector<1x4x256xf32>
    %6 = vector.shape_cast %5 : vector<1x4x256xf32> to vector<4x256xf32>
    %7 = vector.extract_strided_slice %4 {offsets = [0, 0], sizes = [8, 1], strides = [1, 1]} : vector<8x4xf32> to vector<8x1xf32>
    %8 = vector.extract_strided_slice %6 {offsets = [0, 0], sizes = [1, 256], strides = [1, 1]} : vector<4x256xf32> to vector<1x256xf32>
    %9 = vector.broadcast %7 : vector<8x1xf32> to vector<8x256xf32>
    %10 = vector.broadcast %8 : vector<1x256xf32> to vector<8x256xf32>
    %11 = arith.mulf %9, %10 : vector<8x256xf32>
    %12 = arith.addf %3, %11 : vector<8x256xf32>
    %13 = vector.extract_strided_slice %4 {offsets = [0, 1], sizes = [8, 1], strides = [1, 1]} : vector<8x4xf32> to vector<8x1xf32>
    %14 = vector.extract_strided_slice %6 {offsets = [1, 0], sizes = [1, 256], strides = [1, 1]} : vector<4x256xf32> to vector<1x256xf32>
    %15 = vector.broadcast %13 : vector<8x1xf32> to vector<8x256xf32>
    %16 = vector.broadcast %14 : vector<1x256xf32> to vector<8x256xf32>
    %17 = arith.mulf %15, %16 : vector<8x256xf32>
    %18 = arith.addf %12, %17 : vector<8x256xf32>
    %19 = vector.extract_strided_slice %4 {offsets = [0, 2], sizes = [8, 1], strides = [1, 1]} : vector<8x4xf32> to vector<8x1xf32>
    %20 = vector.extract_strided_slice %6 {offsets = [2, 0], sizes = [1, 256], strides = [1, 1]} : vector<4x256xf32> to vector<1x256xf32>
    %21 = vector.broadcast %19 : vector<8x1xf32> to vector<8x256xf32>
    %22 = vector.broadcast %20 : vector<1x256xf32> to vector<8x256xf32>
    %23 = arith.mulf %21, %22 : vector<8x256xf32>
    %24 = arith.addf %18, %23 : vector<8x256xf32>
    %25 = vector.extract_strided_slice %4 {offsets = [0, 3], sizes = [8, 1], strides = [1, 1]} : vector<8x4xf32> to vector<8x1xf32>
    %26 = vector.extract_strided_slice %6 {offsets = [3, 0], sizes = [1, 256], strides = [1, 1]} : vector<4x256xf32> to vector<1x256xf32>
    %27 = vector.broadcast %25 : vector<8x1xf32> to vector<8x256xf32>
    %28 = vector.broadcast %26 : vector<1x256xf32> to vector<8x256xf32>
    %29 = arith.mulf %27, %28 : vector<8x256xf32>
    %30 = arith.addf %24, %29 : vector<8x256xf32>
    %c0_8 = arith.constant 0 : index
    %c0_9 = arith.constant 0 : index
    %31 = vector.load %arg6[%c0_8, %c0_9] : memref<4x8xf32, #tpu.memory_space<vmem>>, vector<4x8xf32>
    %32 = math.tanh %30 : vector<8x256xf32>
    %c0_10 = arith.constant 0 : index
    %c0_11 = arith.constant 0 : index
    %33 = vector.load %arg7[%c0_10, %c0_11] : memref<4x1xf32, #tpu.memory_space<vmem>>, vector<4x1xf32>
    %34 = vector.extract_strided_slice %31 {offsets = [0, 0], sizes = [4, 1], strides = [1, 1]} : vector<4x8xf32> to vector<4x1xf32>
    %35 = vector.extract_strided_slice %32 {offsets = [0, 0], sizes = [1, 256], strides = [1, 1]} : vector<8x256xf32> to vector<1x256xf32>
    %36 = vector.broadcast %34 : vector<4x1xf32> to vector<4x256xf32>
    %37 = vector.broadcast %35 : vector<1x256xf32> to vector<4x256xf32>
    %38 = arith.mulf %36, %37 : vector<4x256xf32>
    %39 = vector.broadcast %33 : vector<4x1xf32> to vector<4x256xf32>
    %40 = arith.addf %39, %38 : vector<4x256xf32>
    %41 = vector.extract_strided_slice %31 {offsets = [0, 1], sizes = [4, 1], strides = [1, 1]} : vector<4x8xf32> to vector<4x1xf32>
    %42 = vector.extract_strided_slice %32 {offsets = [1, 0], sizes = [1, 256], strides = [1, 1]} : vector<8x256xf32> to vector<1x256xf32>
    %43 = vector.broadcast %41 : vector<4x1xf32> to vector<4x256xf32>
    %44 = vector.broadcast %42 : vector<1x256xf32> to vector<4x256xf32>
    %45 = arith.mulf %43, %44 : vector<4x256xf32>
    %46 = arith.addf %40, %45 : vector<4x256xf32>
    %47 = vector.extract_strided_slice %31 {offsets = [0, 2], sizes = [4, 1], strides = [1, 1]} : vector<4x8xf32> to vector<4x1xf32>
    %48 = vector.extract_strided_slice %32 {offsets = [2, 0], sizes = [1, 256], strides = [1, 1]} : vector<8x256xf32> to vector<1x256xf32>
    %49 = vector.broadcast %47 : vector<4x1xf32> to vector<4x256xf32>
    %50 = vector.broadcast %48 : vector<1x256xf32> to vector<4x256xf32>
    %51 = arith.mulf %49, %50 : vector<4x256xf32>
    %52 = arith.addf %46, %51 : vector<4x256xf32>
    %53 = vector.extract_strided_slice %31 {offsets = [0, 3], sizes = [4, 1], strides = [1, 1]} : vector<4x8xf32> to vector<4x1xf32>
    %54 = vector.extract_strided_slice %32 {offsets = [3, 0], sizes = [1, 256], strides = [1, 1]} : vector<8x256xf32> to vector<1x256xf32>
    %55 = vector.broadcast %53 : vector<4x1xf32> to vector<4x256xf32>
    %56 = vector.broadcast %54 : vector<1x256xf32> to vector<4x256xf32>
    %57 = arith.mulf %55, %56 : vector<4x256xf32>
    %58 = arith.addf %52, %57 : vector<4x256xf32>
    %59 = vector.extract_strided_slice %31 {offsets = [0, 4], sizes = [4, 1], strides = [1, 1]} : vector<4x8xf32> to vector<4x1xf32>
    %60 = vector.extract_strided_slice %32 {offsets = [4, 0], sizes = [1, 256], strides = [1, 1]} : vector<8x256xf32> to vector<1x256xf32>
    %61 = vector.broadcast %59 : vector<4x1xf32> to vector<4x256xf32>
    %62 = vector.broadcast %60 : vector<1x256xf32> to vector<4x256xf32>
    %63 = arith.mulf %61, %62 : vector<4x256xf32>
    %64 = arith.addf %58, %63 : vector<4x256xf32>
    %65 = vector.extract_strided_slice %31 {offsets = [0, 5], sizes = [4, 1], strides = [1, 1]} : vector<4x8xf32> to vector<4x1xf32>
    %66 = vector.extract_strided_slice %32 {offsets = [5, 0], sizes = [1, 256], strides = [1, 1]} : vector<8x256xf32> to vector<1x256xf32>
    %67 = vector.broadcast %65 : vector<4x1xf32> to vector<4x256xf32>
    %68 = vector.broadcast %66 : vector<1x256xf32> to vector<4x256xf32>
    %69 = arith.mulf %67, %68 : vector<4x256xf32>
    %70 = arith.addf %64, %69 : vector<4x256xf32>
    %71 = vector.extract_strided_slice %31 {offsets = [0, 6], sizes = [4, 1], strides = [1, 1]} : vector<4x8xf32> to vector<4x1xf32>
    %72 = vector.extract_strided_slice %32 {offsets = [6, 0], sizes = [1, 256], strides = [1, 1]} : vector<8x256xf32> to vector<1x256xf32>
    %73 = vector.broadcast %71 : vector<4x1xf32> to vector<4x256xf32>
    %74 = vector.broadcast %72 : vector<1x256xf32> to vector<4x256xf32>
    %75 = arith.mulf %73, %74 : vector<4x256xf32>
    %76 = arith.addf %70, %75 : vector<4x256xf32>
    %77 = vector.extract_strided_slice %31 {offsets = [0, 7], sizes = [4, 1], strides = [1, 1]} : vector<4x8xf32> to vector<4x1xf32>
    %78 = vector.extract_strided_slice %32 {offsets = [7, 0], sizes = [1, 256], strides = [1, 1]} : vector<8x256xf32> to vector<1x256xf32>
    %79 = vector.broadcast %77 : vector<4x1xf32> to vector<4x256xf32>
    %80 = vector.broadcast %78 : vector<1x256xf32> to vector<4x256xf32>
    %81 = arith.mulf %79, %80 : vector<4x256xf32>
    %82 = arith.addf %76, %81 : vector<4x256xf32>
    %c0_12 = arith.constant 0 : index
    %c0_13 = arith.constant 0 : index
    %c0_14 = arith.constant 0 : index
    %83 = vector.load %arg8[%c0_12, %c0_13, %c0_14] : memref<1x4x256xf32, #tpu.memory_space<vmem>>, vector<1x4x256xf32>
    %84 = vector.shape_cast %83 : vector<1x4x256xf32> to vector<4x256xf32>
    %85 = vector.shape_cast %82 : vector<4x256xf32> to vector<1x4x256xf32>
    tpu.vector_store %arg8[%c0_12, %c0_13, %c0_14], %85 {strides = array<i32>} : memref<1x4x256xf32, #tpu.memory_space<vmem>>, vector<1x4x256xf32>,
    return
  }
  func.func @transform_0(%arg0: i32, %arg1: i32) -> (i32, i32, i32) {
    %c0_i32 = arith.constant 0 : i32
    %c0_i32_0 = arith.constant 0 : i32
    return %arg0, %c0_i32, %arg1 : i32, i32, i32
  }
  func.func @transform_1(%arg0: i32, %arg1: i32) -> (i32, i32) {
    %c0_i32 = arith.constant 0 : i32
    %c0_i32_0 = arith.constant 0 : i32
    return %c0_i32, %arg1 : i32, i32
  }
  func.func @transform_2(%arg0: i32, %arg1: i32) -> (i32, i32) {
    %c0_i32 = arith.constant 0 : i32
    %c0_i32_0 = arith.constant 0 : i32
    %c0_i32_1 = arith.constant 0 : i32
    return %c0_i32, %c0_i32_0 : i32, i32
  }
  func.func @transform_3(%arg0: i32, %arg1: i32) -> (i32, i32) {
    %c0_i32 = arith.constant 0 : i32
    %c0_i32_0 = arith.constant 0 : i32
    %c0_i32_1 = arith.constant 0 : i32
    return %c0_i32, %c0_i32_0 : i32, i32
  }
  func.func @transform_4(%arg0: i32, %arg1: i32) -> (i32, i32) {
    %c0_i32 = arith.constant 0 : i32
    %c0_i32_0 = arith.constant 0 : i32
    %c0_i32_1 = arith.constant 0 : i32
    return %c0_i32, %c0_i32_0 : i32, i32
  }
  func.func @transform_5(%arg0: i32, %arg1: i32) -> (i32, i32) {
    %c0_i32 = arith.constant 0 : i32
    %c0_i32_0 = arith.constant 0 : i32
    %c0_i32_1 = arith.constant 0 : i32
    return %c0_i32, %c0_i32_0 : i32, i32
  }
  func.func @transform_6(%arg0: i32, %arg1: i32) -> (i32, i32, i32) {
    %c0_i32 = arith.constant 0 : i32
    %c0_i32_0 = arith.constant 0 : i32
    return %arg0, %c0_i32, %arg1 : i32, i32, i32
  }
}

</mosaic_0001>

<bundles_post_ra>
// kernel: tpu_custom_call.1
= control target key start
LH: loop header
LB: loop body
LE: loop exit
PB: predicated region body
PF: predicated region fallthrough
CT: control target
= control target key end

     0   :  { %11 = vsyncpa [#allocation3], 0  ;;  %s1115_s0 = inlined_call_operand.vmem [shape: f32[2,4,256], index: 0, kind: input, shape index: {}]   ;;  %s1116_s1 = inlined_call_operand.hbm [shape: f32[8,256], index: 1, kind: input, shape index: {}]   ;;  %s1117_s2 = inlined_call_operand.vmem [shape: f32[8,4], index: 2, kind: input, shape index: {}]   ;;  %s1118_s3 = inlined_call_operand.vmem [shape: f32[8,1], index: 3, kind: input, shape index: {}]   ;;  %s1119_s4 = inlined_call_operand.vmem [shape: f32[4,8], index: 4, kind: input, shape index: {}]   ;;  %s1120_s5 = inlined_call_operand.vmem [shape: f32[4,1], index: 5, kind: input, shape index: {}]   ;;  %s1121_s6 = inlined_call_operand.hbm [shape: f32[2,4,256], index: 6, kind: output, shape index: {}]  }
   0x1   :  { %12 = vsyncpa [#allocation4], 0 }
   0x2   :  { %14 = vsyncpa [#allocation4 + $0x1], 0  ;;  %s931_s21 = smov 0   ;;  %s933_s22 = smov 0  }
   0x3   :  { %s935_s23 = smov 0   ;;  %s937_s24 = smov 0  }
   0x4   :  { %s939_s25 = smov 0   ;;  %s941_s26 = smov 0  }
   0x5 LB: > { %s671_s27 = sadd.s32 4294967295, %s884_s26   ;;  %s672_s28 = sadd.s32 4294967294, %s884_s26   ;;  %s884_s26 = sphi %s941_s26, %s20_s26   ;;  %s880_s25 = sphi %s939_s25, %s1130_s25   ;;  %s876_s24 = sphi %s937_s24, %s1129_s24   ;;  %s872_s23 = sphi %s935_s23, %s1128_s23   ;;  %s868_s22 = sphi %s933_s22, %s1127_s22   ;;  %s864_s21 = sphi %s931_s21, %s1126_s21  }
   0x6   : > { %s32_s29 = sadd.s32 1, %s880_s25  ;;  %s179_s30 = sadd.s32 1, %s872_s23 }
   0x7   : > { %p34_p0 = scmp.ge.s32.totalorder %s32_s29, 2  ;;  %p189_p1 = scmp.ne.s32.totalorder %s872_s23, %s868_s22 }
   0x8   : > { %p190_p2 = scmp.eq.s32.totalorder %s671_s27, 1  ;;  %p195_p3 = scmp.ne.s32.totalorder %s868_s22, %s864_s21 }
   0x9   : > { %s1132_s29 = smov (%p34_p0, %s32_s29), 0  ;;  %p196_p5 = scmp.eq.s32.totalorder %s672_s28, 1 }
   0xa   : > { %p971_p4 = por %p190_p2, %p189_p1  ;;  %s174_s8 = ssub.s32 %s880_s25, %s1132_s29 }
   0xb   : > { %p673_p6 = scmp.ge.s32.totalorder %s884_s26, 1  ;;  %p177_p7 = scmp.eq.s32.totalorder %s174_s8, 0 }
   0xc   : > { %p978_p8 = por %p196_p5, %p195_p3  ;;  %p203_p9 = scmp.lt.s32.totalorder %s884_s26, 3 }
   0xd   : > { %s984_s10 = scalar_select %p177_p7, %s872_s23, %s179_s30  }
   0xe   : > { %p986_p10 = pnand %p673_p6, %p203_p9  ;;  %p990_p11 = scmp.eq.s32.totalorder %s671_s27, 0 }
   0xf   : > { %s886_s13 = smov [#allocation2]  }
  0x10   : > { %p694_p12 = pneg %p986_p10  ;;  %s219_s14 = sshll.u32 %s886_s13, 4  ;;  %s220_s14 = int_to_ptr.vmem [resolvable:$true] %s219_s14 }
  0x11   : > { %s789_s15 = scalar_lea.vmem %s220_s14, 256  ;;  %p797_p5 = scmp.lt.s32.totalorder %s220_s14, %s220_s14 }
  0x12   : > { %p695_p13 = pnand %p990_p11, %p694_p12  ;;  %p790_p1 = scmp.ne.s32.totalorder %s220_s14, %s789_s15 }
  0x13   : > { %p798_p6 = scmp.lt.s32.totalorder %s789_s15, %s789_s15 }
  0x14   : > { %p780_p0 = pneg %p695_p13 }
  0x15   : > { %p799_p7 = por %p798_p6, %p797_p5 }
  0x16   : > { %p792_p2 = pnand %p790_p1, %p780_p0 }
  0x18   : > { %p793_p3 = pneg %p792_p2 }
  0x1a   : > { %p800_p9 = pnand %p799_p7, %p793_p3 }
  0x1c   : > { %803 = shalt.err (!%p800_p9)
}
  0x1d   : > { %697 = dma.hbm_to_vmem [thread:$0]  (!%p695_p13), %s1116_s1, 256, %s220_s14, [#allocation3]  }
  0x1e   : > { %257 = sbr.rel (%p986_p10) target bundleno = 226 (0xe2), region = 44 }
  0x23   : > { %855 = dma.done.wait (%p990_p11), [#allocation3], 256  }
  0x24   : > { %857 = vsyncadd (%p990_p11), [#allocation3], 4294967040  ;;  %v887_v0 = vmov 1   ;;  %v888_v1 = vmov 0   ;;  %v313_v2 = vld [vmem:[%s1117_s2] sm:$0xff]  ;;  %v889_v4 = vmov 2   ;;  %v321_v12 = vlaneseq }
  0x25   : > { %763 = vset.pattern.permute.xlu1 %v887_v0  ;;  %762 = vset.pattern.permute.xlu0 %v888_v1  ;;  %v305_v3 = vld [vmem:[%s1118_s3] sm:$0xff]  ;;  %v890_v6 = vmov 3   ;;  %v891_v8 = vmov 4   ;;  %v892_v9 = vmov 7   ;;  %v893_v10 = vmov 5   ;;  %p292_p10 = scmp.lt.s32.totalorder %s876_s24, 1 }
  0x26   : > { %344 = vperm.xlu1 %763, %v313_v2   ;;  %308 = vperm.xlu0 %762, %v305_v3   ;;  %v421_v5 = vld [vmem:[%s1119_s4] sm:$0xf]  ;;  %v894_v11 = vmov 6   ;;  %v322_v13 = vshrl.u32 %v321_v12, 7  ;;  %v304_v34 = vld [vmem:[#allocation2 + $0x8] sm:$0xff]  ;;  %s288_s17 = sand.u32 1, %s868_s22  }
  0x27   : > { %v424_v7 = vld [vmem:[%s1120_s5] sm:$0xf]  ;;  %s293_s12 = scalar_select %p292_p10, %s876_s24, 1 }
  0x28   : > { %v1024_v14 = vsub.s32 0, %v322_v13  ;;  %v1026_v15 = vsub.s32 4, %v322_v13  ;;  %v1028_v17 = vsub.s32 1, %v322_v13  ;;  %v1030_v18 = vsub.s32 5, %v322_v13  ;;  %v303_v33 = vld [vmem:[#allocation2] sm:$0xff]  ;;  %s678_s18 = sshll.u32 %s288_s17, 3 }
  0x29   : > { %s686_s13 = sshll.u32 %s293_s12, 3  ;;  %v1032_v19 = vsub.s32 2, %v322_v13  ;;  %v1034_v20 = vsub.s32 6, %v322_v13  ;;  %v1040_v25 = vsub.s32 3, %v322_v13  ;;  %v1042_v26 = vsub.s32 7, %v322_v13  ;;  %s687_s19 = sshll.u32 %s876_s24, 7 }
  0x2a   : > { %764 = vset.pattern.permute.xlu1 %v889_v4  ;;  %317 = vperm.xlu0 %762, %v313_v2   ;;  %s299_s16 = scalar_lea.vmem %s1115_s0, %s686_s13  ;;  %s290_s20 = scalar_lea.vmem [#allocation5], %s678_s18 }
  0x2b   : > { %370 = vperm.xlu1 %764, %v313_v2   ;;  %v314_v16 = vld [vmem:[%s299_s16] sm:$0xff]  ;;  %s581_s27 = sshll.u32 %s290_s20, 4  ;;  %s579_s8 = scalar_lea.hbm %s1121_s6, %s687_s19  ;;  %s582_s27 = int_to_ptr.vmem [resolvable:$true] %s581_s27 }
  0x2c   : > { %v324_v21 = vrot.slane %v314_v16, %v1024_v14  ;;  %v328_v22 = vrot.slane %v314_v16, %v1026_v15  ;;  %v350_v23 = vrot.slane %v314_v16, %v1028_v17  ;;  %v354_v24 = vrot.slane %v314_v16, %v1030_v18  ;;  %s565_s11 = scalar_lea.sflag [#allocation4], %s288_s17  ;;  %s804_s12 = scalar_lea.vmem %s582_s27, 128 }
  0x2d   : > { %v376_v27 = vrot.slane %v314_v16, %v1032_v19  ;;  %v380_v28 = vrot.slane %v314_v16, %v1034_v20  ;;  %v402_v37 = vrot.slane %v314_v16, %v1040_v25  ;;  %v406_v38 = vrot.slane %v314_v16, %v1042_v26  ;;  %p805_p11 = scmp.ne.s32.totalorder %s582_s27, %s804_s12  ;;  %s895_s13 = smov [#allocation5]  }
  0x2e   : > { %765 = vset.pattern.permute.xlu0 %v890_v6  ;;  %v334_v31 = vrot.slane %v324_v21, %v1024_v14  ;;  %v338_v32 = vrot.slane %v328_v22, %v1024_v14  ;;  %v360_v35 = vrot.slane %v350_v23, %v1028_v17  ;;  %v364_v36 = vrot.slane %v354_v24, %v1028_v17  ;;  %s808_s14 = sshll.u32 %s895_s13, 4  ;;  %s809_s14 = int_to_ptr.vmem [resolvable:$false] %s808_s14 }
  0x2f   : > { %766 = vset.pattern.permute.xlu1 %v888_v1  ;;  %396 = vperm.xlu0 %765, %v313_v2   ;;  %v386_v39 = vrot.slane %v376_v27, %v1032_v19  ;;  %v390_v40 = vrot.slane %v380_v28, %v1032_v19  ;;  %v412_v49 = vrot.slane %v402_v37, %v1040_v25  ;;  %p806_p12 = pnand %p805_p11, %p971_p4  ;;  %s810_s24 = scalar_lea.vmem %s809_s14, 256 }
  0x30   : > { %427 = vperm.xlu1 %766, %v421_v5   ;;  %v416_v50 = vrot.slane %v406_v38, %v1040_v25  ;;  %p811_p0 = scmp.lt.s32.totalorder %s582_s27, %s809_s14  ;;  %p812_p1 = scmp.lt.s32.totalorder %s810_s24, %s804_s12 }
  0x31   : > { %p807_p13 = pneg %p806_p12 }
  0x32   : > { %p813_p2 = por %p812_p1, %p811_p0 }
  0x33   : > { %767 = vset.pattern.permute.xlu0 %v887_v0 }
  0x34   : > { %442 = vperm.xlu1 %766, %v424_v7   ;;  %448 = vperm.xlu0 %767, %v421_v5   ;;  %p814_p3 = pnand %p813_p2, %p807_p13 }
  0x38   : > { %768 = vset.pattern.permute.xlu1 %v889_v4  ;;  %770 = vset.pattern.permute.xlu0 %v891_v8 }
  0x39   : > { %464 = vperm.xlu1 %768, %v421_v5   ;;  %496 = vperm.xlu0 %770, %v421_v5  }
  0x3d   : > { %769 = vset.pattern.permute.xlu1 %v890_v6  ;;  %773 = vset.pattern.permute.xlu0 %v892_v9 }
  0x3e   : > { %480 = vperm.xlu1 %769, %v421_v5   ;;  %544 = vperm.xlu0 %773, %v421_v5  }
  0x42   : > { %771 = vset.pattern.permute.xlu1 %v893_v10 }
  0x43   : > { %512 = vperm.xlu1 %771, %v421_v5  }
  0x47   : > { %772 = vset.pattern.permute.xlu1 %v894_v11 }
  0x48   : > { %528 = vperm.xlu1 %772, %v421_v5  }
  0xa1   : > { %v309_v29 = vpop.permute.xlu0 %308  ;;  %v345_v30 = vpop.permute.xlu1 %344 }
  0xa2   : > { %v311_v42 = vadd.f32 %v309_v29, %v303_v33  ;;  %v312_v43 = vadd.f32 %v309_v29, %v304_v34  ;;  %v365_v47 = vmul.f32 %v360_v35, %v345_v30  ;;  %v366_v48 = vmul.f32 %v364_v36, %v345_v30 }
  0xa5   : > { %v318_v41 = vpop.permute.xlu0 %317 }
  0xa6   : > { %v339_v44 = vmul.f32 %v334_v31, %v318_v41  ;;  %v340_v45 = vmul.f32 %v338_v32, %v318_v41  ;;  %v371_v46 = vpop.permute.xlu1 %370 }
  0xa7   : > { %v391_v53 = vmul.f32 %v386_v39, %v371_v46  ;;  %v392_v54 = vmul.f32 %v390_v40, %v371_v46 }
  0xa8   : > { %v341_v51 = vadd.f32 %v339_v44, %v311_v42  ;;  %v342_v52 = vadd.f32 %v340_v45, %v312_v43 }
  0xaa   : > { %v367_v55 = vadd.f32 %v365_v47, %v341_v51  ;;  %v368_v56 = vadd.f32 %v366_v48, %v342_v52  ;;  %v397_v57 = vpop.permute.xlu0 %396 }
  0xab   : > { %v417_v58 = vmul.f32 %v412_v49, %v397_v57  ;;  %v418_v59 = vmul.f32 %v416_v50, %v397_v57  ;;  %v428_v60 = vpop.permute.xlu1 %427 }
  0xac   : > { %v393_v61 = vadd.f32 %v391_v53, %v367_v55  ;;  %v394_v62 = vadd.f32 %v392_v54, %v368_v56 }
  0xae   : > { %v419_v63 = vadd.f32 %v417_v58, %v393_v61  ;;  %v420_v0 = vadd.f32 %v418_v59, %v394_v62 }
  0xaf   : > { %v443_v1 = vpop.permute.xlu1 %442  ;;  %v449_v9 = vpop.permute.xlu0 %448 }
  0xb0   : > { %774 = vtanh.f32 %v419_v63 }
  0xb1   : > { %776 = vtanh.f32 %v420_v0 }
  0xb4   : > { %v465_v2 = vpop.permute.xlu1 %464  ;;  %v497_v33 = vpop.permute.xlu0 %496 }
  0xb9   : > { %v481_v4 = vpop.permute.xlu1 %480  ;;  %v545_v49 = vpop.permute.xlu0 %544 }
  0xbd   : > { %v775_v3 = vpop.eup %774 }
  0xbe   : > { %v777_v5 = vpop.eup %776  ;;  %v433_v6 = vrot.slane %v775_v3, %v1024_v14  ;;  %v454_v7 = vrot.slane %v775_v3, %v1028_v17  ;;  %v470_v12 = vrot.slane %v775_v3, %v1032_v19  ;;  %v486_v23 = vrot.slane %v775_v3, %v1040_v25  ;;  %v513_v29 = vpop.permute.xlu1 %512 }
  0xbf   : > { %v437_v8 = vrot.slane %v777_v5, %v1024_v14  ;;  %v458_v10 = vrot.slane %v777_v5, %v1028_v17  ;;  %v474_v16 = vrot.slane %v777_v5, %v1032_v19  ;;  %v490_v28 = vrot.slane %v777_v5, %v1040_v25 }
  0xc0   : > { %v438_v11 = vmul.f32 %v433_v6, %v428_v60  ;;  %v459_v22 = vmul.f32 %v454_v7, %v449_v9  ;;  %v475_v14 = vmul.f32 %v470_v12, %v465_v2  ;;  %v502_v17 = vrot.slane %v775_v3, %v1026_v15 }
  0xc1   : > { %v439_v13 = vmul.f32 %v437_v8, %v428_v60  ;;  %v460_v27 = vmul.f32 %v458_v10, %v449_v9  ;;  %v476_v31 = vmul.f32 %v474_v16, %v465_v2  ;;  %v506_v34 = vrot.slane %v777_v5, %v1026_v15 }
  0xc2   : > { %v445_v21 = vadd.f32 %v443_v1, %v438_v11  ;;  %v491_v35 = vmul.f32 %v486_v23, %v481_v4  ;;  %v518_v36 = vrot.slane %v775_v3, %v1030_v18  ;;  %v492_v38 = vmul.f32 %v490_v28, %v481_v4 }
  0xc3   : > { %v446_v24 = vadd.f32 %v443_v1, %v439_v13  ;;  %v522_v39 = vrot.slane %v777_v5, %v1030_v18  ;;  %v507_v40 = vmul.f32 %v502_v17, %v497_v33  ;;  %v508_v42 = vmul.f32 %v506_v34, %v497_v33  ;;  %v529_v43 = vpop.permute.xlu1 %528 }
  0xc4   : > { %v461_v30 = vadd.f32 %v459_v22, %v445_v21  ;;  %v523_v45 = vmul.f32 %v518_v36, %v513_v29  ;;  %v550_v46 = vrot.slane %v775_v3, %v1042_v26  ;;  %v534_v15 = vrot.slane %v775_v3, %v1034_v20 }
  0xc5   : > { %v462_v32 = vadd.f32 %v460_v27, %v446_v24  ;;  %v524_v48 = vmul.f32 %v522_v39, %v513_v29  ;;  %v554_v18 = vrot.slane %v777_v5, %v1042_v26  ;;  %v538_v50 = vrot.slane %v777_v5, %v1034_v20 }
  0xc6   : > { %v477_v19 = vadd.f32 %v475_v14, %v461_v30  ;;  %v539_v52 = vmul.f32 %v534_v15, %v529_v43  ;;  %v555_v55 = vmul.f32 %v550_v46, %v545_v49 }
  0xc7   : > { %v478_v37 = vadd.f32 %v476_v31, %v462_v32  ;;  %v540_v54 = vmul.f32 %v538_v50, %v529_v43  ;;  %v556_v57 = vmul.f32 %v554_v18, %v545_v49 }
  0xc8   : > { %v493_v25 = vadd.f32 %v491_v35, %v477_v19 }
  0xc9   : > { %v494_v41 = vadd.f32 %v492_v38, %v478_v37 }
  0xca   : > { %v509_v44 = vadd.f32 %v507_v40, %v493_v25 }
  0xcb   : > { %v510_v47 = vadd.f32 %v508_v42, %v494_v41 }
  0xcc   : > { %v525_v51 = vadd.f32 %v523_v45, %v509_v44 }
  0xcd   : > { %v526_v53 = vadd.f32 %v524_v48, %v510_v47 }
  0xce   : > { %v541_v56 = vadd.f32 %v539_v52, %v525_v51 }
  0xcf   : > { %v542_v58 = vadd.f32 %v540_v54, %v526_v53 }
  0xd0   : > { %v557_v59 = vadd.f32 %v555_v55, %v541_v56 }
  0xd1   : > { %v558_v60 = vadd.f32 %v556_v57, %v542_v58 }
  0xd3   : > { %v561_v61 = vcombine.low %v557_v59, %v558_v60 }
  0xd5   : > { %563 = vst [vmem:[%s290_s20] sm:$0xff] %v561_v61 }
  0xd6   : > { %817 = shalt.err (!%p814_p3)
}
  0xd7   : > { %s818_s15 = scalar_lea.hbm %s579_s8, 128  ;;  %s822_s18 = scalar_lea.hbm %s1121_s6, 256 }
  0xd8   : > { %p819_p5 = scmp.ne.s32.totalorder %s579_s8, %s818_s15  ;;  %p823_p9 = scmp.lt.s32.totalorder %s579_s8, %s1121_s6 }
  0xd9   : > { %p824_p10 = scmp.lt.s32.totalorder %s822_s18, %s818_s15 }
  0xda   : > { %p820_p6 = pnand %p819_p5, %p971_p4 }
  0xdb   : > { %p825_p11 = por %p824_p10, %p823_p9 }
  0xdc   : > { %p821_p7 = pneg %p820_p6 }
  0xde   : > { %p826_p12 = pnand %p825_p11, %p821_p7 }
  0xe0   : > { %829 = shalt.err (!%p826_p12)
}
  0xe1   : > { %692 = dma.vmem_to_hbm [thread:$0]  (%p971_p4), %s582_s27, 128, %s579_s8, %s565_s11  }
  0xe2 PF: > { %p704_p13 = scmp.ge.s32.totalorder %s884_s26, 2  ;;  %s593_s28 = sand.u32 1, %s864_s21  }
  0xe3   : > { %s594_s30 = scalar_lea.sflag [#allocation4], %s593_s28 }
  0xe4   : > { %p699_p0 = pnand %p704_p13, %p978_p8 }
  0xe6   : > { %p700_p1 = pneg %p699_p0 }
  0xe8   : > { %859 = dma.done.wait (%p700_p1), %s594_s30, 128  }
  0xe9   : > { %861 = vsyncadd (%p700_p1), %s594_s30, 4294967168  ;;  %s20_s26 = sadd.s32 1, %s884_s26   ;;  %s1126_s21 = smov %s868_s22 }
  0xea   : > { %p17_p2 = scmp.ge.s32.totalorder %s20_s26, 4   ;;  %s1127_s22 = smov %s872_s23 }
  0xeb   : > { %s1128_s23 = smov %s984_s10  ;;  %s1129_s24 = smov %s880_s25 }
  0xec   : > { %s1130_s25 = smov %s1132_s29  ;;  %19 = sbr.rel (!%p17_p2) target bundleno = 5 (0x5), region = 85 }
  0xf1   :  { %599 = vsyncpa [#allocation3], 1 }
  0xf2   :  { %601 = vsyncpa [#allocation3 + $0x1], 1 }
  0xf3   :  { %602 = vsyncpa [#allocation4], 1 }
  0xf4   :  { %604 = vsyncpa [#allocation4 + $0x1], 1 }

</bundles_post_ra>
